<compile_context>
chip_gen: v6e
topology: v6e:2x2x1
jax: 0.10.0
libtpu: 0.0.40
codegen_flags: <defaults>
</compile_context>

<pallas_src>
import functools

import jax
import jax.numpy as jnp
import numpy as np
from jax.experimental import pallas as pl
from jax.experimental.pallas import tpu as pltpu

_BN_EPS = 1e-5

_ACTS = {
    "relu": lambda v: jnp.maximum(v, 0.0),
    "gelu": jax.nn.gelu,
    "silu": jax.nn.silu,
    "selu": jax.nn.selu,
    "hardswish": jax.nn.hard_swish,
    "leakyrelu": lambda v: jax.nn.leaky_relu(v, 0.01),
}
# TODO(synk): 'rrelu' (randomized slope in train mode) has no clean static
# equivalent; eval-mode RReLU == leaky_relu with slope (lower+upper)/2.


def _mlp_extraction_kernel(x_ref, *refs, n_blocks, act, mxu_dtype):
    """refs = (Wt, bt, [W1, b1, W2, b2] * n_blocks, o_ref).

    All weights are BN-folded. Weights are (Cout, Cin); biases are (C, 1).
    x_ref block is (Cin, tn); o_ref block is (Cout, tn).
    """
    o_ref = refs[-1]
    w = refs[:-1]
    act_fn = _ACTS[act]

    def matmul(wm, a):
        if mxu_dtype is not None:
            wm = wm.astype(mxu_dtype)
            a = a.astype(mxu_dtype)
        return jnp.dot(wm, a, preferred_element_type=jnp.float32)

    x = x_ref[...].astype(jnp.float32)                       # (Cin, tn)

    # transfer: Conv1d + BN (folded) + act
    h = act_fn(matmul(w[0][...], x) + w[1][...])             # (Cout, tn)

    # Conv1dBNReLURes blocks: act(BN(Conv(act(BN(Conv(h))))) + h)
    idx = 2
    for _ in range(n_blocks):
        w1, b1 = w[idx][...], w[idx + 1][...]
        w2, b2 = w[idx + 2][...], w[idx + 3][...]
        idx += 4
        y = act_fn(matmul(w1, h) + b1)                       # (Cmid, tn)
        y = matmul(w2, y) + b2                               # (Cout, tn)
        h = act_fn(y + h)                                    # residual + act

    o_ref[...] = h.astype(o_ref.dtype)


def mlp_extraction(x, folded, *, tn=512, activation="relu", mxu_dtype=None):
    """x: (B, Cin, N) -> (B, Cout, N), matching the PyTorch module layout."""
    B, Cin, N = x.shape
    wt, bt = folded["wt"], folded["bt"]
    Cout = wt.shape[0]
    blocks = folded["blocks"]
    n_blocks = len(blocks)

    tn = min(tn, N)
    assert N % tn == 0, "point tile must divide N"
    assert tn == N or tn % 128 == 0, "point tile must be lane-aligned (x128)"

    weights = [wt, bt.reshape(Cout, 1)]
    for (w1, b1, w2, b2) in blocks:
        weights += [w1, b1.reshape(-1, 1), w2, b2.reshape(-1, 1)]

    grid = (B, N // tn)

    def wspec(a):
        nd = a.ndim
        return pl.BlockSpec(a.shape, lambda b, j, _nd=nd: (0,) * _nd)

    in_specs = [pl.BlockSpec((pl.Squeezed(), Cin, tn), lambda b, j: (b, 0, j))]
    in_specs += [wspec(a) for a in weights]
    out_spec = pl.BlockSpec((pl.Squeezed(), Cout, tn), lambda b, j: (b, 0, j))

    # VMEM budget: double-buffered in/out tiles + live intermediates + weights.
    cmax = max([Cin, Cout] + [wb[0].shape[0] for wb in blocks])
    est = 4 * (2 * (Cin + Cout) * tn            # pipelined x / out blocks
               + 4 * cmax * tn                  # h, y, temporaries
               + 2 * sum(int(np.prod(a.shape)) for a in weights))
    vmem_limit = int(min(max(2 * est, 32 * 1024 * 1024), 48 * 1024 * 1024))

    kernel = functools.partial(
        _mlp_extraction_kernel,
        n_blocks=n_blocks, act=activation, mxu_dtype=mxu_dtype)

    return pl.pallas_call(
        kernel,
        out_shape=jax.ShapeDtypeStruct((B, Cout, N), jnp.float32),
        grid=grid,
        in_specs=in_specs,
        out_specs=out_spec,
        compiler_params=pltpu.CompilerParams(
            dimension_semantics=("parallel", "parallel"),
            vmem_limit_bytes=vmem_limit),
    )(x, *weights)


# ----------------------------- parameters ----------------------------------

def init_raw_params(key, in_channels, out_channels, *, blocks=1, res_expansion=1):
    """Raw Conv1d / BatchNorm1d parameters (BN in eval mode: running stats)."""
    def conv(k, cin, cout):
        k1, k2 = jax.random.split(k)
        w = jax.random.normal(k1, (cout, cin), jnp.float32) / jnp.sqrt(cin)
        b = 0.1 * jax.random.normal(k2, (cout,), jnp.float32)
        return w, b

    def bn(k, c):
        k1, k2, k3, k4 = jax.random.split(k, 4)
        gamma = 0.5 + jax.random.uniform(k1, (c,), jnp.float32)
        beta = 0.1 * jax.random.normal(k2, (c,), jnp.float32)
        mean = 0.1 * jax.random.normal(k3, (c,), jnp.float32)
        var = 0.5 + jax.random.uniform(k4, (c,), jnp.float32)
        return gamma, beta, mean, var

    cmid = int(out_channels * res_expansion)
    keys = jax.random.split(key, 2 + 4 * blocks)
    params = {
        "transfer_conv": conv(keys[0], in_channels, out_channels),
        "transfer_bn": bn(keys[1], out_channels),
        "blocks": [],
    }
    for i in range(blocks):
        kc1, kb1, kc2, kb2 = keys[2 + 4 * i: 6 + 4 * i]
        params["blocks"].append({
            "conv1": conv(kc1, out_channels, cmid),
            "bn1": bn(kb1, cmid),
            "conv2": conv(kc2, cmid, out_channels),
            "bn2": bn(kb2, out_channels),
        })
    return params


def fold_bn(raw):
    """Fold eval-mode BatchNorm into the preceding Conv1d (k=1) weight+bias."""
    def fold(conv, bn):
        w, b = conv
        gamma, beta, mean, var = bn
        scale = gamma / jnp.sqrt(var + _BN_EPS)
        return w * scale[:, None], (b - mean) * scale + beta

    wt, bt = fold(raw["transfer_conv"], raw["transfer_bn"])
    blocks = []
    for blk in raw["blocks"]:
        w1, b1 = fold(blk["conv1"], blk["bn1"])
        w2, b2 = fold(blk["conv2"], blk["bn2"])
        blocks.append((w1, b1, w2, b2))
    return {"wt": wt, "bt": bt, "blocks": blocks}


# ----------------------------- reference ------------------------------------

def reference(x, raw, activation="relu"):
    """Pure-JAX forward on the *raw* (un-folded) params, for validation."""
    act = _ACTS[activation]

    def conv(z, w, b):   # Conv1d with kernel_size=1 on (B, C, N)
        return (jnp.einsum("oc,bcn->bon", w, z,
                           precision=jax.lax.Precision.HIGHEST)
                + b[None, :, None])

    def bn(z, p):
        gamma, beta, mean, var = p
        return ((z - mean[None, :, None])
                / jnp.sqrt(var[None, :, None] + _BN_EPS)
                * gamma[None, :, None] + beta[None, :, None])

    h = act(bn(conv(x, *raw["transfer_conv"]), raw["transfer_bn"]))
    for blk in raw["blocks"]:
        y = act(bn(conv(h, *blk["conv1"]), blk["bn1"]))
        y = bn(conv(y, *blk["conv2"]), blk["bn2"])
        h = act(y + h)
    return h


if __name__ == "__main__":
    B, Cin, N = 2, 16, 512
    Cout = 32

    key = jax.random.PRNGKey(0)
    kx, kp = jax.random.split(key)
    x = jax.random.normal(kx, (B, Cin, N), jnp.float32)

    raw = init_raw_params(kp, Cin, Cout, blocks=1, res_expansion=1)
    folded = fold_bn(raw)

    # tn=256 -> grid (2, 2): 4 parallel steps, 256 lanes per tile.
    out = mlp_extraction(x, folded, tn=256, activation="relu", mxu_dtype=None)
    out = jax.block_until_ready(out)
    assert out.shape == (B, Cout, N)

    ref = reference(x, raw, activation="relu")
    np.testing.assert_allclose(np.asarray(out), np.asarray(ref),
                               atol=2e-2, rtol=2e-2)

    print("KERNEL_OK")
</pallas_src>

<mosaic_0001>
module attributes {stable_mosaic.version = 11 : i64} {
  func.func @_mlp_extraction_kernel(%arg0: i32, %arg1: i32, %arg2: memref<1x16x256xf32, #tpu.memory_space<vmem>>, %arg3: memref<32x16xf32, #tpu.memory_space<vmem>>, %arg4: memref<32x1xf32, #tpu.memory_space<vmem>>, %arg5: memref<32x32xf32, #tpu.memory_space<vmem>>, %arg6: memref<32x1xf32, #tpu.memory_space<vmem>>, %arg7: memref<32x32xf32, #tpu.memory_space<vmem>>, %arg8: memref<32x1xf32, #tpu.memory_space<vmem>>, %arg9: memref<1x32x256xf32, #tpu.memory_space<vmem>>) attributes {dimension_semantics = [#tpu.dimension_semantics<parallel>, #tpu.dimension_semantics<parallel>], iteration_bounds = array<i64: 2, 2>, scalar_prefetch = 0 : i64, scratch_operands = 0 : i64, tpu.core_type = #tpu.core_type<tc>, window_params = [{transform_indices = @transform_0, window_bounds = array<i64: 1, 16, 256>}, {pipeline_mode = #tpu.pipeline_mode<synchronous>, transform_indices = @transform_1, window_bounds = array<i64: 32, 16>}, {pipeline_mode = #tpu.pipeline_mode<synchronous>, transform_indices = @transform_2, window_bounds = array<i64: 32, 1>}, {pipeline_mode = #tpu.pipeline_mode<synchronous>, transform_indices = @transform_3, window_bounds = array<i64: 32, 32>}, {pipeline_mode = #tpu.pipeline_mode<synchronous>, transform_indices = @transform_4, window_bounds = array<i64: 32, 1>}, {pipeline_mode = #tpu.pipeline_mode<synchronous>, transform_indices = @transform_5, window_bounds = array<i64: 32, 32>}, {pipeline_mode = #tpu.pipeline_mode<synchronous>, transform_indices = @transform_6, window_bounds = array<i64: 32, 1>}, {transform_indices = @transform_7, window_bounds = array<i64: 1, 32, 256>}]} {
    %c0 = arith.constant 0 : index
    %c0_0 = arith.constant 0 : index
    %c0_1 = arith.constant 0 : index
    %0 = vector.load %arg2[%c0, %c0_0, %c0_1] : memref<1x16x256xf32, #tpu.memory_space<vmem>>, vector<1x16x256xf32>
    %1 = vector.shape_cast %0 : vector<1x16x256xf32> to vector<16x256xf32>
    %c0_2 = arith.constant 0 : index
    %c0_3 = arith.constant 0 : index
    %2 = vector.load %arg3[%c0_2, %c0_3] : memref<32x16xf32, #tpu.memory_space<vmem>>, vector<32x16xf32>
    %cst = arith.constant dense<0.000000e+00> : vector<32x256xf32>
    %3 = tpu.matmul %2, %1, %cst {dimension_numbers = #tpu.dot_dimension_numbers<[1], [0], [0], [1], [0, 0, 1, 1], [], []>} : vector<32x16xf32>, vector<16x256xf32>, vector<32x256xf32> -> vector<32x256xf32>
    %c0_4 = arith.constant 0 : index
    %c0_5 = arith.constant 0 : index
    %4 = vector.load %arg4[%c0_4, %c0_5] : memref<32x1xf32, #tpu.memory_space<vmem>>, vector<32x1xf32>
    %5 = vector.broadcast %4 : vector<32x1xf32> to vector<32x256xf32>
    %6 = arith.addf %3, %5 : vector<32x256xf32>
    %cst_6 = arith.constant 0.000000e+00 : f32
    %7 = vector.broadcast %cst_6 : f32 to vector<32x256xf32>
    %8 = arith.maximumf %6, %7 : vector<32x256xf32>
    %c0_7 = arith.constant 0 : index
    %c0_8 = arith.constant 0 : index
    %9 = vector.load %arg5[%c0_7, %c0_8] : memref<32x32xf32, #tpu.memory_space<vmem>>, vector<32x32xf32>
    %c0_9 = arith.constant 0 : index
    %c0_10 = arith.constant 0 : index
    %10 = vector.load %arg6[%c0_9, %c0_10] : memref<32x1xf32, #tpu.memory_space<vmem>>, vector<32x1xf32>
    %c0_11 = arith.constant 0 : index
    %c0_12 = arith.constant 0 : index
    %11 = vector.load %arg7[%c0_11, %c0_12] : memref<32x32xf32, #tpu.memory_space<vmem>>, vector<32x32xf32>
    %c0_13 = arith.constant 0 : index
    %c0_14 = arith.constant 0 : index
    %12 = vector.load %arg8[%c0_13, %c0_14] : memref<32x1xf32, #tpu.memory_space<vmem>>, vector<32x1xf32>
    %cst_15 = arith.constant dense<0.000000e+00> : vector<32x256xf32>
    %13 = tpu.matmul %9, %8, %cst_15 {dimension_numbers = #tpu.dot_dimension_numbers<[1], [0], [0], [1], [0, 0, 1, 1], [], []>} : vector<32x32xf32>, vector<32x256xf32>, vector<32x256xf32> -> vector<32x256xf32>
    %14 = vector.broadcast %10 : vector<32x1xf32> to vector<32x256xf32>
    %15 = arith.addf %13, %14 : vector<32x256xf32>
    %cst_16 = arith.constant 0.000000e+00 : f32
    %16 = vector.broadcast %cst_16 : f32 to vector<32x256xf32>
    %17 = arith.maximumf %15, %16 : vector<32x256xf32>
    %cst_17 = arith.constant dense<0.000000e+00> : vector<32x256xf32>
    %18 = tpu.matmul %11, %17, %cst_17 {dimension_numbers = #tpu.dot_dimension_numbers<[1], [0], [0], [1], [0, 0, 1, 1], [], []>} : vector<32x32xf32>, vector<32x256xf32>, vector<32x256xf32> -> vector<32x256xf32>
    %19 = vector.broadcast %12 : vector<32x1xf32> to vector<32x256xf32>
    %20 = arith.addf %18, %19 : vector<32x256xf32>
    %21 = arith.addf %20, %8 : vector<32x256xf32>
    %cst_18 = arith.constant 0.000000e+00 : f32
    %22 = vector.broadcast %cst_18 : f32 to vector<32x256xf32>
    %23 = arith.maximumf %21, %22 : vector<32x256xf32>
    %c0_19 = arith.constant 0 : index
    %c0_20 = arith.constant 0 : index
    %c0_21 = arith.constant 0 : index
    %24 = vector.load %arg9[%c0_19, %c0_20, %c0_21] : memref<1x32x256xf32, #tpu.memory_space<vmem>>, vector<1x32x256xf32>
    %25 = vector.shape_cast %24 : vector<1x32x256xf32> to vector<32x256xf32>
    %26 = vector.shape_cast %23 : vector<32x256xf32> to vector<1x32x256xf32>
    tpu.vector_store %arg9[%c0_19, %c0_20, %c0_21], %26 {strides = array<i32>} : memref<1x32x256xf32, #tpu.memory_space<vmem>>, vector<1x32x256xf32>,
    return
  }
  func.func @transform_0(%arg0: i32, %arg1: i32) -> (i32, i32, i32) {
    %c0_i32 = arith.constant 0 : i32
    %c0_i32_0 = arith.constant 0 : i32
    return %arg0, %c0_i32, %arg1 : i32, i32, i32
  }
  func.func @transform_1(%arg0: i32, %arg1: i32) -> (i32, i32) {
    %c0_i32 = arith.constant 0 : i32
    %c0_i32_0 = arith.constant 0 : i32
    %c0_i32_1 = arith.constant 0 : i32
    return %c0_i32, %c0_i32_0 : i32, i32
  }
  func.func @transform_2(%arg0: i32, %arg1: i32) -> (i32, i32) {
    %c0_i32 = arith.constant 0 : i32
    %c0_i32_0 = arith.constant 0 : i32
    %c0_i32_1 = arith.constant 0 : i32
    return %c0_i32, %c0_i32_0 : i32, i32
  }
  func.func @transform_3(%arg0: i32, %arg1: i32) -> (i32, i32) {
    %c0_i32 = arith.constant 0 : i32
    %c0_i32_0 = arith.constant 0 : i32
    %c0_i32_1 = arith.constant 0 : i32
    return %c0_i32, %c0_i32_0 : i32, i32
  }
  func.func @transform_4(%arg0: i32, %arg1: i32) -> (i32, i32) {
    %c0_i32 = arith.constant 0 : i32
    %c0_i32_0 = arith.constant 0 : i32
    %c0_i32_1 = arith.constant 0 : i32
    return %c0_i32, %c0_i32_0 : i32, i32
  }
  func.func @transform_5(%arg0: i32, %arg1: i32) -> (i32, i32) {
    %c0_i32 = arith.constant 0 : i32
    %c0_i32_0 = arith.constant 0 : i32
    %c0_i32_1 = arith.constant 0 : i32
    return %c0_i32, %c0_i32_0 : i32, i32
  }
  func.func @transform_6(%arg0: i32, %arg1: i32) -> (i32, i32) {
    %c0_i32 = arith.constant 0 : i32
    %c0_i32_0 = arith.constant 0 : i32
    %c0_i32_1 = arith.constant 0 : i32
    return %c0_i32, %c0_i32_0 : i32, i32
  }
  func.func @transform_7(%arg0: i32, %arg1: i32) -> (i32, i32, i32) {
    %c0_i32 = arith.constant 0 : i32
    %c0_i32_0 = arith.constant 0 : i32
    return %arg0, %c0_i32, %arg1 : i32, i32, i32
  }
}

</mosaic_0001>

<bundles_post_ra>
// kernel: tpu_custom_call.1
= control target key start
LH: loop header
LB: loop body
LE: loop exit
PB: predicated region body
PF: predicated region fallthrough
CT: control target
= control target key end

     0   :  { %s1584_s0 = inlined_call_operand.vmem [shape: f32[2,16,512], index: 0, kind: input, shape index: {}]   ;;  %s1585_s1 = inlined_call_operand.vmem [shape: f32[32,16], index: 1, kind: input, shape index: {}]   ;;  %s1586_s2 = inlined_call_operand.vmem [shape: f32[32,1], index: 2, kind: input, shape index: {}]   ;;  %s1587_s3 = inlined_call_operand.hbm [shape: f32[32,32], index: 3, kind: input, shape index: {}]   ;;  %s1588_s4 = inlined_call_operand.vmem [shape: f32[32,1], index: 4, kind: input, shape index: {}]   ;;  %s1589_s5 = inlined_call_operand.hbm [shape: f32[32,32], index: 5, kind: input, shape index: {}]   ;;  %s1590_s6 = inlined_call_operand.vmem [shape: f32[32,1], index: 6, kind: input, shape index: {}]   ;;  %s1591_s7 = inlined_call_operand.hbm [shape: f32[2,32,512], index: 7, kind: output, shape index: {}]  }
   0x1   :  { %1597 = sst [smem:[#allocation17_spill]] %s1587_s3 }
   0x2   :  { %12 = vsyncpa [#allocation4], 0 }
   0x3   :  { %13 = vsyncpa [#allocation7], 0 }
   0x4   :  { %14 = vsyncpa [#allocation5], 0 }
   0x5   :  { %16 = vsyncpa [#allocation5 + $0x1], 0  ;;  %s1251_s24 = smov 0   ;;  %s1253_s25 = smov 0  }
   0x6   :  { %s1255_s26 = smov 0   ;;  %s1257_s27 = smov 0  }
   0x7   :  { %s1259_s28 = smov 0   ;;  %s1261_s29 = smov 0  }
   0x8   :  { %s1263_s30 = smov 0   ;;  %s1265_s8 = smov 0  }
   0x9 LB: > { %1598 = sst [smem:[#allocation12_spill]] %s1171_s24  ;;  %s909_s9 = sadd.s32 4294967295, %s1199_s8   ;;  %s1199_s8 = sphi %s1265_s8, %s22_s8   ;;  %s1195_s30 = sphi %s1263_s30, %s1623_s30   ;;  %s1191_s29 = sphi %s1261_s29, %s1622_s29   ;;  %s1187_s28 = sphi %s1259_s28, %s1621_s28   ;;  %s1183_s27 = sphi %s1257_s27, %s1620_s27   ;;  %s1179_s26 = sphi %s1255_s26, %s1619_s26   ;;  %s1175_s25 = sphi %s1253_s25, %s1618_s25   ;;  %s1171_s24 = sphi %s1251_s24, %s1617_s24  }
   0xa   : > { %s910_s10 = sadd.s32 4294967294, %s1199_s8   ;;  %s31_s11 = sadd.s32 1, %s1191_s29 }
   0xb   : > { %s34_s12 = sadd.s32 1, %s1195_s30  ;;  %p32_p0 = scmp.ge.s32.totalorder %s31_s11, 2 }
   0xc   : > { %s43_s13 = sadd.s32 1, %s1179_s26  ;;  %p50_p1 = scmp.ne.s32.totalorder %s1179_s26, %s1175_s25 }
   0xd   : > { %p51_p2 = scmp.eq.s32.totalorder %s1199_s8, 0  ;;  %s1625_s11 = smov (%p32_p0, %s31_s11), 0 }
   0xe   : > { %1599 = sst [smem:[#allocation13_spill]] %s1625_s11  ;;  %s1627_s12 = smov (!%p32_p0, %s34_s12), %s1195_s30 }
   0xf   : > { %s39_s14 = ssub.s32 %s1191_s29, %s1625_s11  ;;  %p1304_p3 = por %p51_p2, %p50_p1 }
  0x10   : > { %p36_p4 = scmp.ge.s32.totalorder %s1627_s12, 2  ;;  %p208_p5 = scmp.eq.s32.totalorder %s909_s9, 3 }
  0x11   : > { %p213_p6 = scmp.ne.s32.totalorder %s1175_s25, %s1171_s24  ;;  %p214_p7 = scmp.eq.s32.totalorder %s910_s10, 3 }
  0x12   : > { %s1629_s12 = smov (%p36_p4, %s1627_s12), 0  ;;  %p1312_p8 = por %p208_p5, %p50_p1 }
  0x13   : > { %1601 = sst [smem:[#allocation14_spill]] %s1629_s12  ;;  %p1316_p9 = por %p214_p7, %p213_p6 }
  0x14   : > { %s1602_s16 = scalar_select %p1312_p8, 1, 0 }
  0x15   : > { %s1603_s17 = scalar_select %p1316_p9, 1, 0 }
  0x16   : > { %s38_s18 = ssub.s32 %s1195_s30, %s1629_s12  ;;  %p911_p10 = scmp.ge.s32.totalorder %s1199_s8, 1 }
  0x17   : > { %1604 = sst [smem:[#allocation15_spill]] %s1603_s17  ;;  %s40_s19 = sor.u32 %s39_s14, %s38_s18 }
  0x18   : > { %p221_p11 = scmp.lt.s32.totalorder %s1199_s8, 5  ;;  %p41_p12 = scmp.eq.s32.totalorder %s40_s19, 0 }
  0x19   : > { %p1328_p0 = scmp.eq.s32.totalorder %s909_s9, 0  ;;  %s1201_s23 = smov [#allocation3]  }
  0x1a   : > { %p1324_p13 = pnand %p911_p10, %p221_p11  ;;  %s239_s10 = sshll.u32 %s1201_s23, 4  ;;  %s240_s10 = int_to_ptr.vmem [resolvable:$true] %s239_s10 }
  0x1b   : > { %s1333_s22 = scalar_select %p41_p12, %s1179_s26, %s43_s13  }
  0x1c   : > { %p956_p1 = pneg %p1324_p13  ;;  %s1202_s18 = smov [#allocation6]  }
  0x1d   : > { %1607 = sst [smem:[#allocation16_spill]] %s1333_s22  ;;  %s255_s9 = sshll.u32 %s1202_s18, 4  ;;  %s256_s9 = int_to_ptr.vmem [resolvable:$true] %s255_s9 }
  0x1e   : > { %p1339_p2 = pnand %p1328_p0, %p956_p1  ;;  %s1058_s19 = scalar_lea.vmem %s240_s10, 512 }
  0x1f   : > { %p1059_p5 = scmp.ne.s32.totalorder %s240_s10, %s1058_s19  ;;  %p1066_p10 = scmp.lt.s32.totalorder %s240_s10, %s240_s10 }
  0x20   : > { %p1049_p4 = pneg %p1339_p2  ;;  %p1067_p11 = scmp.lt.s32.totalorder %s1058_s19, %s1058_s19 }
  0x22   : > { %p1061_p6 = pnand %p1059_p5, %p1049_p4  ;;  %p1068_p12 = por %p1067_p11, %p1066_p10 }
  0x24   : > { %p1062_p7 = pneg %p1061_p6 }
  0x26   : > { %p1069_p9 = pnand %p1068_p12, %p1062_p7 }
  0x28   : > { %1072 = shalt.err (!%p1069_p9)
}
  0x29   : > { %s1203_s13 = smov 128   ;;  %s1204_s23 = smov 8  }
  0x2a   : > { %s1609_s3 = sld [smem:[#allocation17_spill]]  ;;  %s1084_s11 = scalar_lea.vmem %s256_s9, 512 }
  0x2b   : > { %p1085_p1 = scmp.ne.s32.totalorder %s256_s9, %s1084_s11  ;;  %p1092_p8 = scmp.lt.s32.totalorder %s256_s9, %s256_s9 }
  0x2c   : > { %p1093_p10 = scmp.lt.s32.totalorder %s1084_s11, %s1084_s11 }
  0x2d   : > { %p1087_p5 = pnand %p1085_p1, %p1049_p4 }
  0x2e   : > { %p1094_p7 = por %p1093_p10, %p1092_p8 }
  0x2f   : > { %p1088_p6 = pneg %p1087_p5 }
  0x30   : > { %959 = dma.hbm_to_vmem [thread:$0]  (!%p1339_p2), %s1609_s3, 512, %s240_s10, [#allocation4], %s1203_s13, %s1203_s13, %s1204_s23  }
  0x31   : > { %p1095_p9 = pnand %p1094_p7, %p1088_p6 }
  0x33   : > { %1098 = shalt.err (!%p1095_p9)
}
  0x34   : > { %962 = dma.hbm_to_vmem [thread:$0]  (!%p1339_p2), %s1589_s5, 512, %s256_s9, [#allocation7], %s1203_s13, %s1203_s13, %s1204_s23  }
  0x35   : > { %p914_p11 = scmp.ge.s32.totalorder %s1199_s8, 4 }
  0x37   : > { %268 = sbr.rel (%p914_p11) target bundleno = 69 (0x45), region = 40 }
  0x3c   : > { %271 = sbr.rel (!%p1304_p3) target bundleno = 69 (0x45), region = 44  ;;  %s273_s12 = sand.u32 (%p1304_p3), 1, %s1179_s26  }
  0x3d   : > { %s916_s11 = sshll.u32 (%p1304_p3), %s1191_s29, 1  ;;  %s915_s10 = sshll.u32 (%p1304_p3), %s273_s12, 5 }
  0x3e   : > { %s917_s18 = sshll.u32 (%p1304_p3), %s1195_s30, 3  ;;  %s275_s9 = scalar_lea.vmem (%p1304_p3), [#allocation2], %s915_s10 }
  0x3f   : > { %s278_s3 = sadd.s32 (%p1304_p3), %s917_s18, %s916_s11 }
  0x40   : > { %s918_s17 = sshll.u32 (%p1304_p3), %s278_s3, 3 }
  0x41   : > { %s280_s22 = scalar_lea.vmem %s1584_s0, %s918_s17 }
  0x42   : > { %v293_v0 = vld [vmem:[%s280_s22] sm:$0xff]  ;;  %v295_v1 = vld [vmem:[%s280_s22 + $0x8] sm:$0xff] }
  0x43   : > { %v297_v2 = vld [vmem:[%s280_s22 + $0x20] sm:$0xff]  ;;  %294 = vst [vmem:[%s275_s9] sm:$0xff] %v293_v0  ;;  %296 = vst [vmem:[%s275_s9 + $0x8] sm:$0xff] %v295_v1  ;;  %v299_v3 = vld [vmem:[%s280_s22 + $0x28] sm:$0xff] }
  0x44   : > { %298 = vst [vmem:[%s275_s9 + $0x10] sm:$0xff] %v297_v2  ;;  %300 = vst [vmem:[%s275_s9 + $0x18] sm:$0xff] %v299_v3 }
  0x45 PF: > { %309 = sbr.rel (%p1324_p13) target bundleno = 742 (0x2e6), region = 67  ;;  %s1373_s3 = sand.u32 (!%p1324_p13), 1, %s1175_s25  }
  0x46   : > { %s920_s24 = sshll.u32 (!%p1324_p13), %s1373_s3, 5 }
  0x47   : > { %s314_s15 = scalar_lea.vmem (!%p1324_p13), [#allocation2], %s920_s24 }
  0x4a   : > { %1158 = dma.done.wait (%p1328_p0), [#allocation4], 512  }
  0x4b   : > { %1160 = vsyncadd (%p1328_p0), [#allocation4], 4294966784 }
  0x4c   : > { %1162 = dma.done.wait (%p1328_p0), [#allocation7], 512  }
  0x4d   : > { %1164 = vsyncadd (%p1328_p0), [#allocation7], 4294966784  ;;  %v1205_v4 = vmov 0.0   ;;  %v1206_v5 = vmov 0   ;;  %v356_v6 = vld [vmem:[%s314_s15 + $0x18] sm:$0xff]  ;;  %v355_v7 = vld [vmem:[%s314_s15 + $0x10] sm:$0xff] }
  0x4e   : > { %474 = vmatprep.mubr.f32.mxu1 %v1205_v4  ;;  %462 = vmatprep.mubr.f32.mxu0 %v1205_v4  ;;  %v354_v8 = vld [vmem:[%s314_s15 + $0x8] sm:$0xff]  ;;  %v353_v9 = vld [vmem:[%s314_s15] sm:$0xff]  ;;  %v359_v10 = vld [vmem:[%s1585_s1 + $0x10] sm:$0xff]  ;;  %vm385_vm0 = vcmask 130048   ;;  %vm531_vm1 = vcmask 261120   ;;  %s923_s21 = sshll.u32 %s1373_s3, 6 }
  0x4f   : > { %1045 = vset.pattern.permute.xlu0 %v1206_v5  ;;  %1046 = vset.pattern.permute.xlu1 %v1206_v5  ;;  %v357_v11 = vld [vmem:[%s1585_s1] sm:$0xff]  ;;  %v364_v12 = vld [vmem:[%s1586_s2 + $0x18] sm:$0xff]  ;;  %v362_v13 = vld [vmem:[%s1586_s2 + $0x8] sm:$0xff]  ;;  %s1501_s13 = scalar_lea.vmem [#allocation8], %s923_s21  ;;  %s937_s23 = sshll.u32 %s1183_s27, 1 }
  0x50   : > { %942 = vmatprep.subr.mxu1 %v356_v6  ;;  %426 = vmatprep.subr.mxu0 %v356_v6  ;;  %v360_v14 = vld [vmem:[%s1585_s1 + $0x18] sm:$0xff]  ;;  %v358_v15 = vld [vmem:[%s1585_s1 + $0x8] sm:$0xff]  ;;  %v363_v16 = vld [vmem:[%s1586_s2 + $0x10] sm:$0xff]  ;;  %s938_s19 = sshll.u32 %s1187_s28, 4  ;;  %s802_s27 = sshll.u32 %s1501_s13, 4  ;;  %s1521_s27 = int_to_ptr.vmem [resolvable:$true] %s802_s27 }
  0x51   : > { %944 = vmatpush1.msra.mxu1 %v355_v7  ;;  %427 = vmatpush1.msra.mxu0 %v355_v7  ;;  %v361_v17 = vld [vmem:[%s1586_s2] sm:$0xff]  ;;  %v502_v18 = vld [vmem:[%s1588_s4 + $0x18] sm:$0xff]  ;;  %v501_v19 = vld [vmem:[%s1588_s4 + $0x10] sm:$0xff]  ;;  %s799_s12 = sadd.s32 %s938_s19, %s937_s23  ;;  %s787_s14 = scalar_lea.sflag [#allocation5], %s1373_s3 }
  0x52   : > { %943 = vmatprep.subr.mxu1 %v354_v8  ;;  %428 = vmatprep.subr.mxu0 %v354_v8  ;;  %v500_v20 = vld [vmem:[%s1588_s4 + $0x8] sm:$0xff]  ;;  %v499_v21 = vld [vmem:[%s1588_s4] sm:$0xff]  ;;  %v509_v24 = vld [vmem:[%s1590_s6 + $0x10] sm:$0xff]  ;;  %s939_s28 = sshll.u32 %s799_s12, 7  ;;  %s1099_s22 = scalar_lea.vmem %s1521_s27, 1024 }
  0x53   : > { %945 = vmatpush1.msra.mxu1 %v353_v9  ;;  %429 = vmatpush1.msra.mxu0 %v353_v9  ;;  %v507_v22 = vld [vmem:[%s1590_s6] sm:$0xff]  ;;  %v508_v23 = vld [vmem:[%s1590_s6 + $0x8] sm:$0xff]  ;;  %v510_v25 = vld [vmem:[%s1590_s6 + $0x18] sm:$0xff]  ;;  %s1529_s18 = scalar_lea.hbm %s1591_s7, %s939_s28  ;;  %p1100_p3 = scmp.ne.s32.totalorder %s1521_s27, %s1099_s22 }
  0x54   : > { %926 = vmatmul.mubr.msk.f32.vlgmr.msra.gmra.mxu1 %vm385_vm0, %v359_v10  ;;  %924 = vmatmul.mubr.msk.f32.vlgmr.msra.gmra.mxu0 %vm385_vm0, %v357_v11  ;;  %v495_v54 = vld [vmem:[#allocation3] sm:$0xff]  ;;  %v496_v55 = vld [vmem:[#allocation3 + $0x8] sm:$0xff]  ;;  %v497_v56 = vld [vmem:[#allocation3 + $0x10] sm:$0xff]  ;;  %p1610_p8 = scmp.ne.s32.totalorder %s1602_s16, 0  ;;  %s1207_s9 = smov [#allocation8]  }
  0x55   : > { %480 = vmatprep.mubr.f32.mxu1 %v1205_v4  ;;  %468 = vmatprep.mubr.f32.mxu0 %v1205_v4  ;;  %v498_v57 = vld [vmem:[#allocation3 + $0x18] sm:$0xff]  ;;  %s1103_s24 = sshll.u32 %s1207_s9, 4  ;;  %s1104_s24 = int_to_ptr.vmem [resolvable:$false] %s1103_s24 }
  0x56   : > { %382 = vperm.xlu0 %1045, %v364_v12   ;;  %372 = vperm.xlu1 %1046, %v362_v13   ;;  %p1101_p13 = pnand %p1100_p3, %p1610_p8  ;;  %s1105_s15 = scalar_lea.vmem %s1104_s24, 2048 }
  0x57   : > { %p1106_p2 = scmp.lt.s32.totalorder %s1521_s27, %s1104_s24  ;;  %p1107_p4 = scmp.lt.s32.totalorder %s1105_s15, %s1099_s22 }
  0x58   : > { %927 = vmatmul.mubr.msk.f32.gmra.mxu1 %vm385_vm0, %v360_v14  ;;  %925 = vmatmul.mubr.msk.f32.gmra.mxu0 %vm385_vm0, %v358_v15  ;;  %p1102_p0 = pneg %p1101_p13 }
  0x59   : > { %608 = vmatprep.mubr.f32.mxu1 %v1205_v4  ;;  %737 = vmatprep.mubr.f32.mxu0 %v1205_v4  ;;  %p1108_p12 = por %p1107_p4, %p1106_p2 }
  0x5a   : > { %377 = vperm.xlu0 %1045, %v363_v16   ;;  %367 = vperm.xlu1 %1046, %v361_v17  }
  0x5b   : > { %p1109_p1 = pnand %p1108_p12, %p1102_p0 }
  0x5e   : > { %528 = vperm.xlu0 %1045, %v502_v18   ;;  %523 = vperm.xlu1 %1046, %v501_v19  }
  0x62   : > { %518 = vperm.xlu0 %1045, %v500_v20   ;;  %513 = vperm.xlu1 %1046, %v499_v21  }
  0x66   : > { %643 = vperm.xlu0 %1045, %v507_v22   ;;  %648 = vperm.xlu1 %1046, %v508_v23   ;;  %v503_v23 = vld [vmem:[#allocation6] sm:$0xff] }
  0x6a   : > { %653 = vperm.xlu0 %1045, %v509_v24   ;;  %658 = vperm.xlu1 %1046, %v510_v25   ;;  %v504_v24 = vld [vmem:[#allocation6 + $0x8] sm:$0xff]  ;;  %v505_v25 = vld [vmem:[#allocation6 + $0x10] sm:$0xff] }
  0xd1   : > { %v383_v26 = vpop.permute.xlu0 %382  ;;  %v373_v31 = vpop.permute.xlu1 %372 }
  0xd5   : > { %v378_v34 = vpop.permute.xlu0 %377  ;;  %v368_v43 = vpop.permute.xlu1 %367 }
  0xd9   : > { %v529_v63 = vpop.permute.xlu0 %528  ;;  %v524_v1 = vpop.permute.xlu1 %523 }
  0xdd   : > { %v519_v8 = vpop.permute.xlu0 %518  ;;  %v514_v12 = vpop.permute.xlu1 %513 }
 0x114   : > { %v476_v27 = vpop.f32.mrf.mxu1  ;;  %v464_v28 = vpop.f32.mrf.mxu0 }
 0x115   : > { %v1448_v40 = vadd.f32 %v476_v27, %v378_v34  ;;  %v1462_v49 = vadd.f32 %v464_v28, %v368_v43  ;;  %v644_v27 = vpop.permute.xlu0 %643 }
 0x116   : > { %v478_v29 = vpop.f32.mrf.mxu1  ;;  %v466_v30 = vpop.f32.mrf.mxu0 }
 0x117   : > { %v1444_v38 = vadd.f32 %v478_v29, %v378_v34  ;;  %v1457_v47 = vadd.f32 %v466_v30, %v368_v43  ;;  %v491_v48 = vmax.f32 %v1448_v40, 0.0  ;;  %v487_v53 = vmax.f32 %v1462_v49, 0.0 }
 0x118   : > { %v482_v32 = vpop.f32.mrf.mxu1  ;;  %v470_v33 = vpop.f32.mrf.mxu0 }
 0x119   : > { %v1442_v35 = vadd.f32 %v482_v32, %v383_v26  ;;  %v1454_v45 = vadd.f32 %v470_v33, %v373_v31  ;;  %v492_v46 = vmax.f32 %v1444_v38, 0.0  ;;  %v488_v52 = vmax.f32 %v1457_v47, 0.0  ;;  %v649_v33 = vpop.permute.xlu1 %648 }
 0x11a   : > { %v484_v36 = vpop.f32.mrf.mxu1  ;;  %v472_v37 = vpop.f32.mrf.mxu0 }
 0x11b   : > { %v1446_v39 = vadd.f32 %v484_v36, %v383_v26  ;;  %v1451_v42 = vadd.f32 %v472_v37, %v373_v31  ;;  %v493_v44 = vmax.f32 %v1442_v35, 0.0  ;;  %v489_v51 = vmax.f32 %v1454_v45, 0.0  ;;  %v506_v26 = vld [vmem:[#allocation6 + $0x18] sm:$0xff] }
 0x11d   : > { %v494_v41 = vmax.f32 %v1446_v39, 0.0  ;;  %v490_v50 = vmax.f32 %v1451_v42, 0.0 }
 0x11f   : > { %568 = vmatprep.subr.mxu1 %v494_v41 }
 0x120   : > { %569 = vmatpush1.msra.mxu1 %v493_v44 }
 0x121   : > { %570 = vmatprep.subr.mxu1 %v492_v46 }
 0x122   : > { %571 = vmatpush1.msra.mxu1 %v491_v48 }
 0x123   : > { %572 = vmatprep.subr.mxu1 %v490_v50 }
 0x124   : > { %573 = vmatpush1.msra.mxu1 %v489_v51 }
 0x125   : > { %574 = vmatprep.subr.mxu1 %v488_v52 }
 0x126   : > { %575 = vmatpush1.msra.mxu1 %v487_v53 }
 0x127   : > { %928 = vmatmul.mubr.msk.f32.vlgmr.msra.gmra.mxu1 %vm531_vm1, %v495_v54 }
 0x128   : > { %614 = vmatprep.mubr.f32.mxu1 %v1205_v4 }
 0x12b   : > { %929 = vmatmul.mubr.msk.f32.gmra.mxu1 %vm531_vm1, %v496_v55  ;;  %v654_v55 = vpop.permute.xlu0 %653 }
 0x12c   : > { %620 = vmatprep.mubr.f32.mxu1 %v1205_v4 }
 0x12f   : > { %930 = vmatmul.mubr.msk.f32.gmra.mxu1 %vm531_vm1, %v497_v56 }
 0x130   : > { %626 = vmatprep.mubr.f32.mxu1 %v1205_v4 }
 0x133   : > { %931 = vmatmul.mubr.msk.f32.gmra.mxu1 %vm531_vm1, %v498_v57 }
 0x1e7   : > { %v610_v58 = vpop.f32.mrf.mxu1 }
 0x1e8   : > { %v611_v17 = vadd.f32 %v610_v58, %v514_v12 }
 0x1e9   : > { %v612_v59 = vpop.f32.mrf.mxu1 }
 0x1ea   : > { %v613_v15 = vadd.f32 %v612_v59, %v514_v12  ;;  %v633_v22 = vmax.f32 %v611_v17, 0.0 }
 0x1eb   : > { %v616_v60 = vpop.f32.mrf.mxu1 }
 0x1ec   : > { %v617_v13 = vadd.f32 %v616_v60, %v519_v8  ;;  %v634_v21 = vmax.f32 %v613_v15, 0.0  ;;  %v659_v60 = vpop.permute.xlu1 %658 }
 0x1ed   : > { %v618_v61 = vpop.f32.mrf.mxu1 }
 0x1ee   : > { %v619_v10 = vadd.f32 %v618_v61, %v519_v8  ;;  %v635_v20 = vmax.f32 %v617_v13, 0.0 }
 0x1ef   : > { %v622_v62 = vpop.f32.mrf.mxu1 }
 0x1f0   : > { %v623_v9 = vadd.f32 %v622_v62, %v524_v1  ;;  %v636_v19 = vmax.f32 %v619_v10, 0.0 }
 0x1f1   : > { %v624_v0 = vpop.f32.mrf.mxu1 }
 0x1f2   : > { %v625_v6 = vadd.f32 %v624_v0, %v524_v1  ;;  %v637_v18 = vmax.f32 %v623_v9, 0.0 }
 0x1f3   : > { %v628_v2 = vpop.f32.mrf.mxu1 }
 0x1f4   : > { %v629_v3 = vadd.f32 %v628_v2, %v529_v63  ;;  %v638_v16 = vmax.f32 %v625_v6, 0.0 }
 0x1f5   : > { %v630_v5 = vpop.f32.mrf.mxu1 }
 0x1f6   : > { %v631_v7 = vadd.f32 %v630_v5, %v529_v63  ;;  %v639_v14 = vmax.f32 %v629_v3, 0.0 }
 0x1f8   : > { %v640_v11 = vmax.f32 %v631_v7, 0.0 }
 0x1fa   : > { %697 = vmatprep.subr.mxu0 %v640_v11 }
 0x1fb   : > { %698 = vmatpush1.msra.mxu0 %v639_v14 }
 0x1fc   : > { %699 = vmatprep.subr.mxu0 %v638_v16 }
 0x1fd   : > { %700 = vmatpush1.msra.mxu0 %v637_v18 }
 0x1fe   : > { %701 = vmatprep.subr.mxu0 %v636_v19 }
 0x1ff   : > { %702 = vmatpush1.msra.mxu0 %v635_v20 }
 0x200   : > { %703 = vmatprep.subr.mxu0 %v634_v21 }
 0x201   : > { %704 = vmatpush1.msra.mxu0 %v633_v22 }
 0x202   : > { %932 = vmatmul.mubr.msk.f32.vlgmr.msra.gmra.mxu0 %vm531_vm1, %v503_v23 }
 0x203   : > { %743 = vmatprep.mubr.f32.mxu0 %v1205_v4 }
 0x206   : > { %933 = vmatmul.mubr.msk.f32.gmra.mxu0 %vm531_vm1, %v504_v24 }
 0x207   : > { %749 = vmatprep.mubr.f32.mxu0 %v1205_v4 }
 0x20a   : > { %934 = vmatmul.mubr.msk.f32.gmra.mxu0 %vm531_vm1, %v505_v25 }
 0x20b   : > { %755 = vmatprep.mubr.f32.mxu0 %v1205_v4 }
 0x20e   : > { %935 = vmatmul.mubr.msk.f32.gmra.mxu0 %vm531_vm1, %v506_v26 }
 0x2c2   : > { %v739_v28 = vpop.f32.mrf.mxu0 }
 0x2c3   : > { %v740_v29 = vadd.f32 %v739_v28, %v644_v27 }
 0x2c4   : > { %v741_v30 = vpop.f32.mrf.mxu0 }
 0x2c5   : > { %v762_v31 = vadd.f32 %v740_v29, %v487_v53  ;;  %v742_v32 = vadd.f32 %v741_v30, %v644_v27 }
 0x2c6   : > { %v745_v34 = vpop.f32.mrf.mxu0 }
 0x2c7   : > { %v770_v36 = vmax.f32 %v762_v31, 0.0  ;;  %v763_v4 = vadd.f32 %v742_v32, %v488_v52  ;;  %v746_v37 = vadd.f32 %v745_v34, %v649_v33 }
 0x2c8   : > { %v747_v43 = vpop.f32.mrf.mxu0 }
 0x2c9   : > { %778 = vst [vmem:[%s1501_s13] sm:$0xff] %v770_v36  ;;  %v771_v54 = vmax.f32 %v763_v4, 0.0  ;;  %v764_v49 = vadd.f32 %v746_v37, %v489_v51  ;;  %v748_v53 = vadd.f32 %v747_v43, %v649_v33 }
 0x2ca   : > { %v751_v56 = vpop.f32.mrf.mxu0 }
 0x2cb   : > { %779 = vst [vmem:[%s1501_s13 + $0x8] sm:$0xff] %v771_v54  ;;  %v772_v47 = vmax.f32 %v764_v49, 0.0  ;;  %v765_v52 = vadd.f32 %v748_v53, %v490_v50  ;;  %v752_v57 = vadd.f32 %v751_v56, %v654_v55 }
 0x2cc   : > { %v753_v58 = vpop.f32.mrf.mxu0 }
 0x2cd   : > { %780 = vst [vmem:[%s1501_s13 + $0x10] sm:$0xff] %v772_v47  ;;  %v773_v59 = vmax.f32 %v765_v52, 0.0  ;;  %v766_v45 = vadd.f32 %v752_v57, %v491_v48  ;;  %v754_v51 = vadd.f32 %v753_v58, %v654_v55 }
 0x2ce   : > { %v757_v61 = vpop.f32.mrf.mxu0 }
 0x2cf   : > { %781 = vst [vmem:[%s1501_s13 + $0x18] sm:$0xff] %v773_v59  ;;  %v774_v42 = vmax.f32 %v766_v45, 0.0  ;;  %v767_v50 = vadd.f32 %v754_v51, %v492_v46  ;;  %v758_v62 = vadd.f32 %v757_v61, %v659_v60 }
 0x2d0   : > { %v759_v63 = vpop.f32.mrf.mxu0 }
 0x2d1   : > { %782 = vst [vmem:[%s1501_s13 + $0x20] sm:$0xff] %v774_v42  ;;  %v775_v40 = vmax.f32 %v767_v50, 0.0  ;;  %v768_v48 = vadd.f32 %v758_v62, %v493_v44  ;;  %v760_v0 = vadd.f32 %v759_v63, %v659_v60 }
 0x2d3   : > { %783 = vst [vmem:[%s1501_s13 + $0x28] sm:$0xff] %v775_v40  ;;  %v776_v38 = vmax.f32 %v768_v48, 0.0  ;;  %v769_v46 = vadd.f32 %v760_v0, %v494_v41 }
 0x2d5   : > { %784 = vst [vmem:[%s1501_s13 + $0x30] sm:$0xff] %v776_v38  ;;  %v777_v35 = vmax.f32 %v769_v46, 0.0 }
 0x2d7   : > { %785 = vst [vmem:[%s1501_s13 + $0x38] sm:$0xff] %v777_v35 }
 0x2d8   : > { %1112 = shalt.err (!%p1109_p1)
}
 0x2d9   : > { %s1113_s17 = scalar_lea.hbm %s1529_s18, 1024  ;;  %s1117_s13 = scalar_lea.hbm %s1591_s7, 4096 }
 0x2da   : > { %p1114_p5 = scmp.ne.s32.totalorder %s1529_s18, %s1113_s17  ;;  %p1118_p7 = scmp.lt.s32.totalorder %s1529_s18, %s1591_s7 }
 0x2db   : > { %p1119_p9 = scmp.lt.s32.totalorder %s1117_s13, %s1113_s17 }
 0x2dc   : > { %p1115_p6 = pnand %p1114_p5, %p1610_p8 }
 0x2dd   : > { %p1120_p11 = por %p1119_p9, %p1118_p7 }
 0x2de   : > { %p1116_p10 = pneg %p1115_p6 }
 0x2e0   : > { %p1121_p3 = pnand %p1120_p11, %p1116_p10 }
 0x2e2   : > { %1124 = shalt.err (!%p1121_p3)
}
 0x2e3   : > { %s1208_s12 = smov 256   ;;  %s1209_s28 = smov 512  }
 0x2e4   : > { %s1210_s11 = smov 16  }
 0x2e5   : > { %954 = dma.vmem_to_hbm [thread:$0]  (%p1610_p8), %s1521_s27, 1024, %s1529_s18, %s787_s14, %s1208_s12, %s1209_s28, %s1210_s11  }
 0x2e6 PF: > { %s1611_s10 = sld [smem:[#allocation12_spill]]  ;;  %p971_p13 = scmp.ge.s32.totalorder %s1199_s8, 2 }
 0x2e7   : > { %s1612_s22 = sld [smem:[#allocation15_spill]] }
 0x2ec   : > { %s817_s9 = sand.u32 1, %s1611_s10  }
 0x2ed   : > { %p1613_p0 = scmp.ne.s32.totalorder %s1612_s22, 0  ;;  %s818_s24 = scalar_lea.sflag [#allocation5], %s817_s9 }
 0x2ef   : > { %p964_p2 = pnand %p971_p13, %p1613_p0 }
 0x2f1   : > { %p965_p4 = pneg %p964_p2 }
 0x2f3   : > { %1166 = dma.done.wait (%p965_p4), %s818_s24, 1024  }
 0x2f4   : > { %1168 = vsyncadd (%p965_p4), %s818_s24, 4294966272  ;;  %s22_s8 = sadd.s32 1, %s1199_s8   ;;  %s1614_s16 = sld [smem:[#allocation16_spill]] }
 0x2f5   : > { %p19_p12 = scmp.ge.s32.totalorder %s22_s8, 6   ;;  %s1615_s3 = sld [smem:[#allocation13_spill]] }
 0x2f6   : > { %s1616_s18 = sld [smem:[#allocation14_spill]]  ;;  %s1617_s24 = smov %s1175_s25 }
 0x2f7   : > { %s1618_s25 = smov %s1179_s26  ;;  %s1620_s27 = smov %s1191_s29 }
 0x2f8   : > { %s1621_s28 = smov %s1195_s30  ;;  %21 = sbr.rel (!%p19_p12) target bundleno = 9 (0x9), region = 120 }
 0x2fa   : > { %s1619_s26 = smov %s1614_s16 }
 0x2fb   : > { %s1622_s29 = smov %s1615_s3 }
 0x2fc   : > { %s1623_s30 = smov %s1616_s18 }
 0x2fd   :  { %823 = vsyncpa [#allocation4], 1 }
 0x2fe   :  { %825 = vsyncpa [#allocation4 + $0x1], 1 }
 0x2ff   :  { %826 = vsyncpa [#allocation7], 1 }
 0x300   :  { %827 = vsyncpa [#allocation5], 1 }
 0x301   :  { %829 = vsyncpa [#allocation5 + $0x1], 1 }

</bundles_post_ra>
